<compile_context>
chip_gen: v6e
topology: v6e:2x2x1
jax: 0.10.0
libtpu: 0.0.40
codegen_flags: <defaults>
</compile_context>

<pallas_src>
import jax
import jax.numpy as jnp
from jax.experimental import pallas as pl
from jax.experimental.pallas import tpu as pltpu

LN_EPS = 1e-5  # nn.LayerNorm default


def topic_model_kernel(x_ref, w1_ref, p_ref, w2_ref, b2_ref, out_ref):
    # x: (TB, H)
    x = x_ref[...]

    # full_connection_layer: (TB, H) @ (H, H) + b1
    h = jnp.dot(x, w1_ref[...], preferred_element_type=jnp.float32) + p_ref[0:1, :]

    # LayerNorm over last dim (biased variance, eps inside rsqrt == nn.LayerNorm)
    mean = jnp.mean(h, axis=-1, keepdims=True)
    centered = h - mean
    var = jnp.mean(centered * centered, axis=-1, keepdims=True)
    h_norm = centered * jax.lax.rsqrt(var + LN_EPS)
    h_norm = h_norm * p_ref[1:2, :] + p_ref[2:3, :]

    # ReLU
    act = jnp.maximum(h_norm, 0.0)

    # classifier: (TB, H) @ (H, LP) + b2  (LP is the lane-dense padded width)
    out_ref[...] = (jnp.dot(act, w2_ref[...], preferred_element_type=jnp.float32)
                    + b2_ref[...]).astype(out_ref.dtype)


def topic_model_forward(x, w1, b1, gamma, beta, w2, b2, *, row_tile=256):
    B, H = x.shape
    L = w2.shape[1]

    # Lane-dense padded output width (multiple of 128). Zero-padding is exact.
    LP = ((L + 127) // 128) * 128

    # Pack the three (H,)-sized parameters into one (3, H) VMEM-resident array.
    params3 = jnp.stack([b1, gamma, beta], axis=0).astype(jnp.float32)  # (3, H)

    # Zero-pad classifier weight / bias to LP output columns.
    w2p = jnp.zeros((H, LP), jnp.float32).at[:, :L].set(w2)
    b2p = jnp.zeros((1, LP), jnp.float32).at[:, :L].set(b2)

    # Row tile: big enough to amortize per-step overhead, multiple of 8
    # (sublane). VMEM is never the constraint at H=32, so size purely for
    # overhead amortization / MXU row-fill.
    b_sublane = ((B + 7) // 8) * 8
    TB = min(row_tile, b_sublane)
    B_pad = ((B + TB - 1) // TB) * TB
    grid = (B_pad // TB,)

    x_pad = x.astype(jnp.float32)
    if B_pad != B:
        x_pad = jnp.zeros((B_pad, H), jnp.float32).at[:B, :].set(x_pad)

    cost = pl.CostEstimate(
        flops=2 * B_pad * H * (H + LP),
        transcendentals=0,
        bytes_accessed=4 * (B_pad * H + H * H + 3 * H + H * LP + LP + B_pad * LP),
    )

    out_padded = pl.pallas_call(
        topic_model_kernel,
        out_shape=jax.ShapeDtypeStruct((B_pad, LP), jnp.float32),
        grid=grid,
        in_specs=[
            pl.BlockSpec((TB, H), lambda i: (i, 0)),   # x: tiled over rows
            pl.BlockSpec((H, H), lambda i: (0, 0)),    # w1: VMEM-resident
            pl.BlockSpec((3, H), lambda i: (0, 0)),    # [b1; gamma; beta]
            pl.BlockSpec((H, LP), lambda i: (0, 0)),   # w2 (padded)
            pl.BlockSpec((1, LP), lambda i: (0, 0)),   # b2 (padded)
        ],
        out_specs=pl.BlockSpec((TB, LP), lambda i: (i, 0)),
        compiler_params=pltpu.CompilerParams(
            dimension_semantics=("parallel",),  # shards row tiles on v7x 2-TC
        ),
        cost_estimate=cost,
    )(x_pad, w1.astype(jnp.float32), params3, w2p, b2p)

    # Slice away row padding and the lane padding of the output.
    return out_padded[:B, :L]


def reference_forward(x, w1, b1, gamma, beta, w2, b2):
    h = x @ w1 + b1
    mean = jnp.mean(h, axis=-1, keepdims=True)
    var = jnp.mean((h - mean) ** 2, axis=-1, keepdims=True)
    hn = (h - mean) / jnp.sqrt(var + LN_EPS) * gamma + beta
    act = jnp.maximum(hn, 0.0)
    return act @ w2 + b2


if __name__ == "__main__":
    # topic_config.num_topics = 32 (hidden_dim), topic_config.num_labels = 8
    H, L = 32, 8

    key = jax.random.PRNGKey(0)
    kx, kw1, kb1, kw2, kb2, kx2 = jax.random.split(key, 6)

    # Deterministic parameter init (PyTorch Linear-style uniform bounds).
    bound1 = 1.0 / jnp.sqrt(H)
    w1 = jax.random.uniform(kw1, (H, H), jnp.float32, -bound1, bound1)
    b1 = jax.random.uniform(kb1, (H,), jnp.float32, -bound1, bound1)
    gamma = jnp.ones((H,), jnp.float32)   # LayerNorm weight
    beta = jnp.zeros((H,), jnp.float32)   # LayerNorm bias
    w2 = jax.random.uniform(kw2, (H, L), jnp.float32, -bound1, bound1)
    b2 = jax.random.uniform(kb2, (L,), jnp.float32, -bound1, bound1)

    # Small batch (single grid step).
    B = 8
    x = jax.random.normal(kx, (B, H), dtype=jnp.float32)
    logits = topic_model_forward(x, w1, b1, gamma, beta, w2, b2)
    jax.block_until_ready(logits)
    ref = reference_forward(x, w1, b1, gamma, beta, w2, b2)
    assert logits.shape == (B, L)
    assert jnp.allclose(logits, ref, atol=1e-5, rtol=1e-5), "mismatch vs reference (B=8)"

    # Larger batch: exercises the row grid, row padding, and parallel axis.
    B2 = 300
    x2 = jax.random.normal(kx2, (B2, H), dtype=jnp.float32)
    logits2 = topic_model_forward(x2, w1, b1, gamma, beta, w2, b2)
    jax.block_until_ready(logits2)
    ref2 = reference_forward(x2, w1, b1, gamma, beta, w2, b2)
    assert logits2.shape == (B2, L)
    assert jnp.allclose(logits2, ref2, atol=1e-5, rtol=1e-5), "mismatch vs reference (B=300)"

    # TODO(synk): word_topics_id gather branch, feature_influence concat, and
    # CrossEntropyLoss (labels path) are not implemented in the kernel; only
    # the document_topic_vector -> logits path is covered.

    print("KERNEL_OK")
</pallas_src>

<mosaic_0001>
module attributes {stable_mosaic.version = 11 : i64} {
  func.func @topic_model_kernel(%arg0: i32, %arg1: memref<8x32xf32, #tpu.memory_space<vmem>>, %arg2: memref<32x32xf32, #tpu.memory_space<vmem>>, %arg3: memref<3x32xf32, #tpu.memory_space<vmem>>, %arg4: memref<32x128xf32, #tpu.memory_space<vmem>>, %arg5: memref<1x128xf32, #tpu.memory_space<vmem>>, %arg6: memref<8x128xf32, #tpu.memory_space<vmem>>) attributes {dimension_semantics = [#tpu.dimension_semantics<parallel>], iteration_bounds = array<i64: 1>, scalar_prefetch = 0 : i64, scratch_operands = 0 : i64, tpu.core_type = #tpu.core_type<tc>, window_params = [{transform_indices = @transform_0, window_bounds = array<i64: 8, 32>}, {pipeline_mode = #tpu.pipeline_mode<synchronous>, transform_indices = @transform_1, window_bounds = array<i64: 32, 32>}, {pipeline_mode = #tpu.pipeline_mode<synchronous>, transform_indices = @transform_2, window_bounds = array<i64: 3, 32>}, {pipeline_mode = #tpu.pipeline_mode<synchronous>, transform_indices = @transform_3, window_bounds = array<i64: 32, 128>}, {pipeline_mode = #tpu.pipeline_mode<synchronous>, transform_indices = @transform_4, window_bounds = array<i64: 1, 128>}, {transform_indices = @transform_5, window_bounds = array<i64: 8, 128>}]} {
    %c0 = arith.constant 0 : index
    %c0_0 = arith.constant 0 : index
    %0 = vector.load %arg1[%c0, %c0_0] : memref<8x32xf32, #tpu.memory_space<vmem>>, vector<8x32xf32>
    %c0_1 = arith.constant 0 : index
    %c0_2 = arith.constant 0 : index
    %1 = vector.load %arg2[%c0_1, %c0_2] : memref<32x32xf32, #tpu.memory_space<vmem>>, vector<32x32xf32>
    %cst = arith.constant dense<0.000000e+00> : vector<8x32xf32>
    %2 = tpu.matmul %0, %1, %cst {dimension_numbers = #tpu.dot_dimension_numbers<[1], [0], [0], [1], [0, 0, 1, 1], [], []>} : vector<8x32xf32>, vector<32x32xf32>, vector<8x32xf32> -> vector<8x32xf32>
    %c0_3 = arith.constant 0 : index
    %c0_4 = arith.constant 0 : index
    %3 = vector.load %arg3[%c0_3, %c0_4] : memref<3x32xf32, #tpu.memory_space<vmem>>, vector<1x32xf32>
    %4 = vector.broadcast %3 : vector<1x32xf32> to vector<8x32xf32>
    %5 = arith.addf %2, %4 : vector<8x32xf32>
    %cst_5 = arith.constant dense<0.000000e+00> : vector<8xf32>
    %6 = vector.multi_reduction <add>, %5, %cst_5 [1] : vector<8x32xf32> to vector<8xf32>
    %7 = vector.shape_cast %6 : vector<8xf32> to vector<8x1xf32>
    %cst_6 = arith.constant 3.200000e+01 : f32
    %8 = vector.broadcast %cst_6 : f32 to vector<8x1xf32>
    %9 = arith.divf %7, %8 : vector<8x1xf32>
    %10 = vector.broadcast %9 : vector<8x1xf32> to vector<8x32xf32>
    %11 = arith.subf %5, %10 : vector<8x32xf32>
    %12 = arith.mulf %11, %11 : vector<8x32xf32>
    %cst_7 = arith.constant dense<0.000000e+00> : vector<8xf32>
    %13 = vector.multi_reduction <add>, %12, %cst_7 [1] : vector<8x32xf32> to vector<8xf32>
    %14 = vector.shape_cast %13 : vector<8xf32> to vector<8x1xf32>
    %cst_8 = arith.constant 3.200000e+01 : f32
    %15 = vector.broadcast %cst_8 : f32 to vector<8x1xf32>
    %16 = arith.divf %14, %15 : vector<8x1xf32>
    %cst_9 = arith.constant 9.99999974E-6 : f32
    %17 = vector.broadcast %cst_9 : f32 to vector<8x1xf32>
    %18 = arith.addf %16, %17 : vector<8x1xf32>
    %19 = math.rsqrt %18 : vector<8x1xf32>
    %20 = vector.broadcast %19 : vector<8x1xf32> to vector<8x32xf32>
    %21 = arith.mulf %11, %20 : vector<8x32xf32>
    %c1 = arith.constant 1 : index
    %c0_10 = arith.constant 0 : index
    %22 = vector.load %arg3[%c1, %c0_10] : memref<3x32xf32, #tpu.memory_space<vmem>>, vector<1x32xf32>
    %23 = vector.broadcast %22 : vector<1x32xf32> to vector<8x32xf32>
    %24 = arith.mulf %21, %23 : vector<8x32xf32>
    %c2 = arith.constant 2 : index
    %c0_11 = arith.constant 0 : index
    %25 = vector.load %arg3[%c2, %c0_11] : memref<3x32xf32, #tpu.memory_space<vmem>>, vector<1x32xf32>
    %26 = vector.broadcast %25 : vector<1x32xf32> to vector<8x32xf32>
    %27 = arith.addf %24, %26 : vector<8x32xf32>
    %cst_12 = arith.constant 0.000000e+00 : f32
    %28 = vector.broadcast %cst_12 : f32 to vector<8x32xf32>
    %29 = arith.maximumf %27, %28 : vector<8x32xf32>
    %c0_13 = arith.constant 0 : index
    %c0_14 = arith.constant 0 : index
    %30 = vector.load %arg4[%c0_13, %c0_14] : memref<32x128xf32, #tpu.memory_space<vmem>>, vector<32x128xf32>
    %cst_15 = arith.constant dense<0.000000e+00> : vector<8x128xf32>
    %31 = tpu.matmul %29, %30, %cst_15 {dimension_numbers = #tpu.dot_dimension_numbers<[1], [0], [0], [1], [0, 0, 1, 1], [], []>} : vector<8x32xf32>, vector<32x128xf32>, vector<8x128xf32> -> vector<8x128xf32>
    %c0_16 = arith.constant 0 : index
    %c0_17 = arith.constant 0 : index
    %32 = vector.load %arg5[%c0_16, %c0_17] : memref<1x128xf32, #tpu.memory_space<vmem>>, vector<1x128xf32>
    %33 = vector.broadcast %32 : vector<1x128xf32> to vector<8x128xf32>
    %34 = arith.addf %31, %33 : vector<8x128xf32>
    %c0_18 = arith.constant 0 : index
    %c0_19 = arith.constant 0 : index
    %35 = vector.load %arg6[%c0_18, %c0_19] : memref<8x128xf32, #tpu.memory_space<vmem>>, vector<8x128xf32>
    tpu.vector_store %arg6[%c0_18, %c0_19], %34 {strides = array<i32>} : memref<8x128xf32, #tpu.memory_space<vmem>>, vector<8x128xf32>,
    return
  }
  func.func @transform_0(%arg0: i32) -> (i32, i32) {
    %c0_i32 = arith.constant 0 : i32
    %c0_i32_0 = arith.constant 0 : i32
    return %arg0, %c0_i32 : i32, i32
  }
  func.func @transform_1(%arg0: i32) -> (i32, i32) {
    %c0_i32 = arith.constant 0 : i32
    %c0_i32_0 = arith.constant 0 : i32
    %c0_i32_1 = arith.constant 0 : i32
    return %c0_i32, %c0_i32_0 : i32, i32
  }
  func.func @transform_2(%arg0: i32) -> (i32, i32) {
    %c0_i32 = arith.constant 0 : i32
    %c0_i32_0 = arith.constant 0 : i32
    %c0_i32_1 = arith.constant 0 : i32
    return %c0_i32, %c0_i32_0 : i32, i32
  }
  func.func @transform_3(%arg0: i32) -> (i32, i32) {
    %c0_i32 = arith.constant 0 : i32
    %c0_i32_0 = arith.constant 0 : i32
    %c0_i32_1 = arith.constant 0 : i32
    return %c0_i32, %c0_i32_0 : i32, i32
  }
  func.func @transform_4(%arg0: i32) -> (i32, i32) {
    %c0_i32 = arith.constant 0 : i32
    %c0_i32_0 = arith.constant 0 : i32
    %c0_i32_1 = arith.constant 0 : i32
    return %c0_i32, %c0_i32_0 : i32, i32
  }
  func.func @transform_5(%arg0: i32) -> (i32, i32) {
    %c0_i32 = arith.constant 0 : i32
    %c0_i32_0 = arith.constant 0 : i32
    return %arg0, %c0_i32 : i32, i32
  }
}

</mosaic_0001>

<bundles_post_ra>
// kernel: tpu_custom_call.1
= control target key start
LH: loop header
LB: loop body
LE: loop exit
PB: predicated region body
PF: predicated region fallthrough
CT: control target
= control target key end

     0   :  { %10 = vsyncpa [#allocation3], 0  ;;  %s509_s0 = inlined_call_operand.hbm [shape: f32[8,32], index: 0, kind: input, shape index: {}]   ;;  %s510_s1 = inlined_call_operand.hbm [shape: f32[32,32], index: 1, kind: input, shape index: {}]   ;;  %s511_s2 = inlined_call_operand.hbm [shape: f32[3,32], index: 2, kind: input, shape index: {}]   ;;  %s512_s3 = inlined_call_operand.hbm [shape: f32[32,128], index: 3, kind: input, shape index: {}]   ;;  %s513_s4 = inlined_call_operand.vmem [shape: f32[1,128], index: 4, kind: input, shape index: {}]   ;;  %s514_s5 = inlined_call_operand.hbm [shape: f32[8,128], index: 5, kind: output, shape index: {}]  }
   0x1   :  { %11 = vsyncpa [#allocation6], 0 }
   0x2   :  { %12 = vsyncpa [#allocation9], 0 }
   0x3   :  { %13 = vsyncpa [#allocation4], 0  ;;  %s442_s18 = smov [#allocation5]  }
   0x4   :  { %s29_s19 = sshll.u32 %s442_s18, 4  ;;  %s30_s19 = int_to_ptr.vmem [resolvable:$true] %s29_s19 }
   0x5   :  { %s342_s20 = scalar_lea.vmem %s30_s19, 512  ;;  %p347_p1 = scmp.lt.s32.totalorder %s30_s19, %s30_s19 }
   0x6   :  { %p343_p0 = scmp.ne.s32.totalorder %s30_s19, %s342_s20  ;;  %p348_p2 = scmp.lt.s32.totalorder %s342_s20, %s342_s20 }
   0x8   :  { %p349_p3 = por %p348_p2, %p347_p1 }
   0xa   :  { %p350_p4 = pnand %p349_p3, %p343_p0 }
   0xc   :  { %353 = shalt.err (!%p350_p4)
}
   0xd   :  { %s443_s21 = smov 128   ;;  %s444_s22 = smov 8  }
   0xe   :  { %35 = dma.hbm_to_vmem [thread:$0]  %s510_s1, 512, %s30_s19, [#allocation6], %s443_s21, %s443_s21, %s444_s22  }
   0xf   :  { %s445_s25 = smov [#allocation2]   ;;  %s446_s27 = smov [#allocation7]  }
  0x10   :  { %s20_s26 = sshll.u32 %s445_s25, 4  ;;  %s42_s28 = sshll.u32 %s446_s27, 4  ;;  %s21_s26 = int_to_ptr.vmem [resolvable:$true] %s20_s26  ;;  %s43_s28 = int_to_ptr.vmem [resolvable:$true] %s42_s28 }
  0x11   :  { %s362_s29 = scalar_lea.vmem %s21_s26, 128  ;;  %p367_p6 = scmp.lt.s32.totalorder %s21_s26, %s21_s26 }
  0x12   :  { %p363_p5 = scmp.ne.s32.totalorder %s21_s26, %s362_s29  ;;  %p368_p7 = scmp.lt.s32.totalorder %s362_s29, %s362_s29 }
  0x14   :  { %p369_p8 = por %p368_p7, %p367_p6 }
  0x16   :  { %p370_p9 = pnand %p369_p8, %p363_p5 }
  0x18   :  { %373 = shalt.err (!%p370_p9)
}
  0x19   :  { %23 = dma.hbm_to_vmem [thread:$0]  %s509_s0, 128, %s21_s26, [#allocation3]  }
  0x1a   :  { %s382_s7 = scalar_lea.vmem %s43_s28, 64  ;;  %p387_p11 = scmp.lt.s32.totalorder %s43_s28, %s43_s28 }
  0x1b   :  { %p383_p10 = scmp.ne.s32.totalorder %s43_s28, %s382_s7  ;;  %p388_p12 = scmp.lt.s32.totalorder %s382_s7, %s382_s7 }
  0x1d   :  { %p389_p13 = por %p388_p12, %p387_p11 }
  0x1f   :  { %p390_p0 = pnand %p389_p13, %p383_p10 }
  0x21   :  { %393 = shalt.err (!%p390_p0)
}
  0x22   :  { %45 = dma.hbm_to_vmem [thread:$0]  %s511_s2, 64, %s43_s28, [#allocation6]  }
  0x23   :  { %s447_s9 = smov [#allocation8]  }
  0x24   :  { %s51_s10 = sshll.u32 %s447_s9, 4  ;;  %s52_s10 = int_to_ptr.vmem [resolvable:$true] %s51_s10 }
  0x25   :  { %s402_s11 = scalar_lea.vmem %s52_s10, 512  ;;  %p407_p2 = scmp.lt.s32.totalorder %s52_s10, %s52_s10 }
  0x26   :  { %p403_p1 = scmp.ne.s32.totalorder %s52_s10, %s402_s11  ;;  %p408_p3 = scmp.lt.s32.totalorder %s402_s11, %s402_s11 }
  0x28   :  { %p409_p4 = por %p408_p3, %p407_p2 }
  0x2a   :  { %p410_p5 = pnand %p409_p4, %p403_p1 }
  0x2c   :  { %413 = shalt.err (!%p410_p5)
}
  0x2d   :  { %57 = dma.hbm_to_vmem [thread:$0]  %s512_s3, 512, %s52_s10, [#allocation9], %s443_s21, %s443_s21, %s444_s22  }
  0x2e   :  { %434 = dma.done.wait [#allocation3], 128  }
  0x2f   :  { %435 = vsyncadd [#allocation3], 4294967168 }
  0x30   :  { %436 = dma.done.wait [#allocation6], 576  }
  0x31   :  { %437 = vsyncadd [#allocation6], 4294966720 }
  0x32   :  { %438 = dma.done.wait [#allocation9], 512  }
  0x33   :  { %439 = vsyncadd [#allocation9], 4294966784  ;;  %v448_v0 = vmov 0.0   ;;  %vm449_vm0 = vmmov 0   ;;  %v76_v1 = vld [vmem:[#allocation5 + $0x18] sm:$0xff]  ;;  %v75_v2 = vld [vmem:[#allocation5 + $0x10] sm:$0xff] }
  0x34   :  { %301 = vmatprep.subr.mxu0 %v448_v0  ;;  %309 = vmatprep.mubr.msk.f32.mxu0 %vm449_vm0, %v448_v0  ;;  %v74_v3 = vld [vmem:[#allocation5 + $0x8] sm:$0xff]  ;;  %v73_v4 = vld [vmem:[#allocation5] sm:$0xff]  ;;  %v72_v5 = vld [vmem:[#allocation2] sm:$0xff]  ;;  %vm82_vm1 = vcmask 261120   ;;  %s450_s13 = smov [#allocation10]  }
  0x35   :  { %312 = vmatprep.subr.mxu1 %v448_v0  ;;  %320 = vmatprep.mubr.msk.f32.mxu1 %vm449_vm0, %v448_v0  ;;  %v285_v6 = vld [vmem:[#allocation7] ss:$0 sm:$0xff]  ;;  %v185_v17 = vld [vmem:[#allocation8 + $0x10] sm:$0xff]  ;;  %v184_v18 = vld [vmem:[#allocation8 + $0x8] sm:$0xff]  ;;  %s274_s14 = sshll.u32 %s450_s13, 4  ;;  %s275_s14 = int_to_ptr.vmem [resolvable:$true] %s274_s14 }
  0x36   :  { %302 = vmatpush3.msra.mxu0 %v76_v1  ;;  %v186_v16 = vld [vmem:[#allocation8 + $0x18] sm:$0xff]  ;;  %v183_v19 = vld [vmem:[#allocation8] sm:$0xff]  ;;  %v289_v30 = vld [vmem:[%s513_s4] ss:$0 sm:$0xff]  ;;  %s414_s15 = scalar_lea.vmem %s275_s14, 128  ;;  %p419_p7 = scmp.lt.s32.totalorder %s275_s14, %s275_s14 }
  0x37   :  { %303 = vmatprep.subr.mxu0 %v448_v0  ;;  %313 = vmatpush3.msra.mxu1 %v186_v16  ;;  %v287_v24 = vld [vmem:[#allocation7 + $0x1] ss:$0 sm:$0xff]  ;;  %v288_v26 = vld [vmem:[#allocation7 + $0x2] ss:$0 sm:$0xff]  ;;  %p415_p6 = scmp.ne.s32.totalorder %s275_s14, %s414_s15  ;;  %p420_p8 = scmp.lt.s32.totalorder %s414_s15, %s414_s15 }
  0x38   :  { %304 = vmatpush3.msra.mxu0 %v75_v2  ;;  %314 = vmatprep.subr.mxu1 %v448_v0 }
  0x39   :  { %305 = vmatprep.subr.mxu0 %v448_v0  ;;  %315 = vmatpush3.msra.mxu1 %v185_v17  ;;  %p421_p9 = por %p420_p8, %p419_p7 }
  0x3a   :  { %306 = vmatpush3.msra.mxu0 %v74_v3  ;;  %316 = vmatprep.subr.mxu1 %v448_v0 }
  0x3b   :  { %307 = vmatprep.subr.mxu0 %v448_v0  ;;  %317 = vmatpush3.msra.mxu1 %v184_v18  ;;  %p422_p10 = pnand %p421_p9, %p415_p6 }
  0x3c   :  { %308 = vmatpush3.msra.mxu0 %v73_v4  ;;  %318 = vmatprep.subr.mxu1 %v448_v0 }
  0x3d   :  { %310 = vmatmul.mubr.msk.f32.vlgmr.msra.gmra.mxu0 %vm82_vm1, %v72_v5  ;;  %319 = vmatpush3.msra.mxu1 %v183_v19 }
  0xfd   :  { %v152_v7 = vpop.f32.mrf.mxu0 }
  0xfe   :  { %v153_v8 = vadd.f32 %v285_v6, %v152_v7 }
  0xff   :  { %v311_v9 = vpop.f32.mrf.mxu0 }
 0x100   :  { %v156_v10 = vsel %vm82_vm1, %v153_v8, 0.0 }
 0x101   :  { %157 = vadd.xlane.f32.xlu0 %v156_v10 }
 0x18a   :  { %v158_v11 = vpop.xlane.xlu0 %157 }
 0x18b   :  { %v160_v12 = vmul.f32 0.03125, %v158_v11 }
 0x18d   :  { %v161_v13 = vsub.f32 %v153_v8, %v160_v12 }
 0x18f   :  { %v162_v14 = vmul.f32 %v161_v13, %v161_v13 }
 0x191   :  { %v163_v15 = vsel %vm82_vm1, %v162_v14, 0.0 }
 0x192   :  { %164 = vadd.xlane.f32.xlu0 %v163_v15 }
 0x21b   :  { %v165_v20 = vpop.xlane.xlu0 %164 }
 0x21c   :  { %v166_v21 = vmul.f32 0.03125, %v165_v20 }
 0x21e   :  { %v167_v22 = vadd.f32 1e-05, %v166_v21 }
 0x220   :  { %332 = vrsqrt.f32 %v167_v22 }
 0x22d   :  { %v333_v23 = vpop.eup %332 }
 0x22e   :  { %v169_v25 = vmul.f32 %v333_v23, %v161_v13 }
 0x230   :  { %v175_v27 = vmul.f32 %v287_v24, %v169_v25 }
 0x232   :  { %v181_v28 = vadd.f32 %v288_v26, %v175_v27 }
 0x234   :  { %v182_v29 = vmax.f32 %v181_v28, 0.0 }
 0x236   :  { %321 = vmatmul.mubr.msk.f32.vlgmr.msra.gmra.mxu1 %vm82_vm1, %v182_v29 }
 0x2f6   :  { %v263_v31 = vpop.f32.mrf.mxu1 }
 0x2f7   :  { %v264_v32 = vadd.f32 %v289_v30, %v263_v31 }
 0x2f8   :  { %v322_v33 = vpop.f32.mrf.mxu1 }
 0x2f9   :  { %267 = vst [vmem:[#allocation10] sm:$0xff] %v264_v32 }
 0x2fa   :  { %425 = shalt.err (!%p422_p10)
}
 0x2fb   :  { %277 = dma.vmem_to_hbm [thread:$0]  %s275_s14, 128, %s514_s5, [#allocation4]  }
 0x2fc   :  { %440 = dma.done.wait [#allocation4], 128  }
 0x2fd   :  { %441 = vsyncadd [#allocation4], 4294967168 }
 0x2fe   :  { %281 = vsyncpa [#allocation3], 1 }
 0x2ff   :  { %282 = vsyncpa [#allocation6], 1 }
 0x300   :  { %283 = vsyncpa [#allocation9], 1 }
 0x301   :  { %284 = vsyncpa [#allocation4], 1 }

</bundles_post_ra>
